<compile_context>
chip_gen: v5e
topology: v5e:2x2
jax: 0.10.0
libtpu: 0.0.40
codegen_flags: <defaults>
</compile_context>

<pallas_src>
import functools

import jax
import jax.numpy as jnp
from jax.experimental import pallas as pl
from jax.experimental.pallas import tpu as pltpu


def _round_up(x, m):
    return ((x + m - 1) // m) * m


def _pick_tile(dim, tile_max, align):
    """Tile size (multiple of `align`, ~<= tile_max) minimizing padding waste."""
    padded = _round_up(dim, align)
    n_blocks = max(1, -(-padded // tile_max))
    tile = _round_up(-(-padded // n_blocks), align)
    padded = _round_up(dim, tile)
    return tile, padded


# ---------------------------------------------------------------------------
# Kernel 1: Gumbel-softmax weight normalization (one-shot, row-tiled).
# ---------------------------------------------------------------------------
def _gts_weight_kernel(w_ref, u_ref, wn_ref, *, t):
    # eps = -log(-log(U)); same formula as the PyTorch reference, no clamping.
    eps = -jnp.log(-jnp.log(u_ref[...]))
    logits = (jnp.log(w_ref[...]) + eps) / t
    # Max-subtraction is an exact softmax invariance (keeps exp() in range).
    logits = logits - jnp.max(logits, axis=1, keepdims=True)
    e = jnp.exp(logits)
    # Exact division (runs once; approx reciprocal caused the f32 mismatch).
    wn_ref[...] = (e / jnp.sum(e, axis=1, keepdims=True)).astype(wn_ref.dtype)


def _normalize_weights(W, u, t, out_dtype, row_block=512):
    """Row-tiled softmax normalization of W; output emitted in `out_dtype`."""
    # TODO(synk): the uniform noise could be generated in-kernel with
    # pltpu.prng_seed/prng_random_bits to drop one HBM input stream.
    in_size, out_size = W.shape
    tr, r_pad = _pick_tile(in_size, row_block, 8)
    W32 = W.astype(jnp.float32)
    u32 = u.astype(jnp.float32)
    if r_pad != in_size:
        # Benign row padding (W=1, U=0.5): each padded row is a valid softmax
        # row and is sliced off below.
        W32 = jnp.pad(W32, ((0, r_pad - in_size), (0, 0)), constant_values=1.0)
        u32 = jnp.pad(u32, ((0, r_pad - in_size), (0, 0)), constant_values=0.5)

    wn = pl.pallas_call(
        functools.partial(_gts_weight_kernel, t=float(t)),
        out_shape=jax.ShapeDtypeStruct((r_pad, out_size), out_dtype),
        grid=(r_pad // tr,),
        in_specs=[
            pl.BlockSpec((tr, out_size), lambda i: (i, 0)),
            pl.BlockSpec((tr, out_size), lambda i: (i, 0)),
        ],
        out_specs=pl.BlockSpec((tr, out_size), lambda i: (i, 0)),
        compiler_params=pltpu.CompilerParams(dimension_semantics=("parallel",)),
    )(W32, u32)
    return wn[:in_size] if r_pad != in_size else wn


# ---------------------------------------------------------------------------
# Kernel 2: (M, N, K)-tiled matmul, accumulating into the resident f32 output.
# ---------------------------------------------------------------------------
def _gts_matmul_kernel(x_ref, w_ref, o_ref):
    k = pl.program_id(2)
    prod = jnp.dot(x_ref[...], w_ref[...], preferred_element_type=jnp.float32)

    @pl.when(k == 0)
    def _():
        o_ref[...] = prod

    @pl.when(k != 0)
    def _():
        o_ref[...] += prod


def gts_linear(x, W, u, t=10.0, *, compute_dtype=jnp.bfloat16,
               tm_max=512, tn_max=512, tk_max=1024):
    """Pallas implementation of GTS_Linear.forward.

    x: (..., in_size); W: (in_size, out_size); u: uniform(0,1) noise of W.shape.
    compute_dtype: MXU input dtype (bf16 default = fast path; f32 = strict).
    """
    in_size, out_size = W.shape
    assert x.shape[-1] == in_size
    lead = x.shape[:-1]
    x2 = x.reshape(-1, in_size)
    M = x2.shape[0]

    # 1) One-shot Gumbel-softmax normalization of W (already in compute dtype).
    w_norm = _normalize_weights(W, u, t, compute_dtype)

    # 2) Tile / padding selection.
    tn, n_pad = _pick_tile(out_size, tn_max, 128)     # lane-dense output tiles
    if in_size <= tk_max:
        tk, k_pad = in_size, in_size                  # whole K -> W resident
    else:
        tk, k_pad = _pick_tile(in_size, tk_max, 256)  # feed 256-wide MXU
    tm, m_pad = _pick_tile(M, tm_max, 16)             # 16-aligned for bf16

    # Cast once here (not per-tile in the kernel).  Zero padding is exact:
    # padded K rows/cols contribute nothing; padded M/N are sliced off.
    x_p = x2.astype(compute_dtype)
    if m_pad != M or k_pad != in_size:
        x_p = jnp.pad(x_p, ((0, m_pad - M), (0, k_pad - in_size)))
    w_p = w_norm
    if k_pad != in_size or n_pad != out_size:
        w_p = jnp.pad(w_p, ((0, k_pad - in_size), (0, n_pad - out_size)))

    grid = (m_pad // tm, n_pad // tn, k_pad // tk)

    # Double-buffered x/w tiles + resident f32 output block (+ headroom),
    # capped at 48 MiB so it also fits v7x's 64 MiB physical VMEM.
    csize = jnp.dtype(compute_dtype).itemsize
    footprint = 2 * (tm * tk + tk * tn) * csize + 2 * tm * tn * 4
    vmem_limit = int(min(max(footprint + (8 << 20), 16 << 20), 48 << 20))

    out = pl.pallas_call(
        _gts_matmul_kernel,
        out_shape=jax.ShapeDtypeStruct((m_pad, n_pad), jnp.float32),
        grid=grid,
        in_specs=[
            pl.BlockSpec((tm, tk), lambda i, j, k: (i, k)),   # x tile
            pl.BlockSpec((tk, tn), lambda i, j, k: (k, j)),   # W_n tile
        ],
        out_specs=pl.BlockSpec((tm, tn), lambda i, j, k: (i, j)),
        compiler_params=pltpu.CompilerParams(
            dimension_semantics=("parallel", "parallel", "arbitrary"),
            vmem_limit_bytes=vmem_limit,
        ),
    )(x_p, w_p)

    return out[:M, :out_size].astype(x.dtype).reshape(lead + (out_size,))


def gts_linear_ref(x, W, u, t=10.0):
    """Pure-JAX reference mirroring the PyTorch forward exactly."""
    eps = -jnp.log(-jnp.log(u))
    log_w = jnp.log(W) + eps
    exp_w = jnp.exp(log_w / t)
    w_n = exp_w / jnp.sum(exp_w, axis=1, keepdims=True)
    return jnp.matmul(x, w_n, precision=jax.lax.Precision.HIGHEST)


if __name__ == "__main__":
    # Small shapes consistent with the module: batch=2, seq=8, in=32, out=16.
    batch, seq, in_size, out_size = 2, 8, 32, 16
    t = 10.0

    key = jax.random.PRNGKey(0)
    kx, ku = jax.random.split(key)

    x = jax.random.normal(kx, (batch, seq, in_size), dtype=jnp.float32)
    # Parameter init exactly as in __init__: torch.ones(in_size, out_size).
    W = jnp.ones((in_size, out_size), dtype=jnp.float32)
    # Deterministic stand-in for torch.rand(W.shape).
    u = jax.random.uniform(ku, (in_size, out_size), dtype=jnp.float32,
                           minval=1e-6, maxval=1.0)

    ref = gts_linear_ref(x, W, u, t=t)

    # Strict f32 path.
    out_f32 = jax.block_until_ready(
        gts_linear(x, W, u, t=t, compute_dtype=jnp.float32))
    assert out_f32.shape == (batch, seq, out_size)
    assert jnp.allclose(out_f32, ref, atol=2e-3, rtol=2e-3), "f32 mismatch"

    # Default bf16 MXU fast path (f32 accumulation), looser tolerance.
    out_bf16 = jax.block_until_ready(gts_linear(x, W, u, t=t))
    assert out_bf16.shape == (batch, seq, out_size)
    assert jnp.allclose(out_bf16, ref, atol=3e-2, rtol=3e-2), "bf16 mismatch"

    print("KERNEL_OK")
</pallas_src>

<mosaic_0001>
module attributes {stable_mosaic.version = 11 : i64} {
  func.func @_gts_weight_kernel(%arg0: i32, %arg1: memref<32x16xf32, #tpu.memory_space<vmem>>, %arg2: memref<32x16xf32, #tpu.memory_space<vmem>>, %arg3: memref<32x16xf32, #tpu.memory_space<vmem>>) attributes {dimension_semantics = [#tpu.dimension_semantics<parallel>], iteration_bounds = array<i64: 1>, scalar_prefetch = 0 : i64, scratch_operands = 0 : i64, tpu.core_type = #tpu.core_type<tc>, window_params = [{transform_indices = @transform_0, window_bounds = array<i64: 32, 16>}, {transform_indices = @transform_1, window_bounds = array<i64: 32, 16>}, {transform_indices = @transform_2, window_bounds = array<i64: 32, 16>}]} {
    %c0 = arith.constant 0 : index
    %c0_0 = arith.constant 0 : index
    %0 = vector.load %arg2[%c0, %c0_0] : memref<32x16xf32, #tpu.memory_space<vmem>>, vector<32x16xf32>
    %1 = math.log %0 : vector<32x16xf32>
    %cst = arith.constant 0.000000e+00 : f32
    %2 = vector.broadcast %cst : f32 to vector<32x16xf32>
    %3 = arith.subf %2, %1 : vector<32x16xf32>
    %4 = math.log %3 : vector<32x16xf32>
    %cst_1 = arith.constant 0.000000e+00 : f32
    %5 = vector.broadcast %cst_1 : f32 to vector<32x16xf32>
    %6 = arith.subf %5, %4 : vector<32x16xf32>
    %c0_2 = arith.constant 0 : index
    %c0_3 = arith.constant 0 : index
    %7 = vector.load %arg1[%c0_2, %c0_3] : memref<32x16xf32, #tpu.memory_space<vmem>>, vector<32x16xf32>
    %8 = math.log %7 : vector<32x16xf32>
    %9 = arith.addf %8, %6 : vector<32x16xf32>
    %cst_4 = arith.constant 1.000000e+01 : f32
    %10 = vector.broadcast %cst_4 : f32 to vector<32x16xf32>
    %11 = arith.divf %9, %10 : vector<32x16xf32>
    %cst_5 = arith.constant dense<0xFF800000> : vector<32xf32>
    %12 = vector.multi_reduction <maximumf>, %11, %cst_5 [1] : vector<32x16xf32> to vector<32xf32>
    %13 = vector.shape_cast %12 : vector<32xf32> to vector<32x1xf32>
    %14 = vector.broadcast %13 : vector<32x1xf32> to vector<32x16xf32>
    %15 = arith.subf %11, %14 : vector<32x16xf32>
    %16 = math.exp %15 : vector<32x16xf32>
    %cst_6 = arith.constant dense<0.000000e+00> : vector<32xf32>
    %17 = vector.multi_reduction <add>, %16, %cst_6 [1] : vector<32x16xf32> to vector<32xf32>
    %18 = vector.shape_cast %17 : vector<32xf32> to vector<32x1xf32>
    %19 = vector.broadcast %18 : vector<32x1xf32> to vector<32x16xf32>
    %20 = arith.divf %16, %19 : vector<32x16xf32>
    %c0_7 = arith.constant 0 : index
    %c0_8 = arith.constant 0 : index
    %21 = vector.load %arg3[%c0_7, %c0_8] : memref<32x16xf32, #tpu.memory_space<vmem>>, vector<32x16xf32>
    tpu.vector_store %arg3[%c0_7, %c0_8], %20 {strides = array<i32>} : memref<32x16xf32, #tpu.memory_space<vmem>>, vector<32x16xf32>,
    return
  }
  func.func @transform_0(%arg0: i32) -> (i32, i32) {
    %c0_i32 = arith.constant 0 : i32
    %c0_i32_0 = arith.constant 0 : i32
    return %arg0, %c0_i32 : i32, i32
  }
  func.func @transform_1(%arg0: i32) -> (i32, i32) {
    %c0_i32 = arith.constant 0 : i32
    %c0_i32_0 = arith.constant 0 : i32
    return %arg0, %c0_i32 : i32, i32
  }
  func.func @transform_2(%arg0: i32) -> (i32, i32) {
    %c0_i32 = arith.constant 0 : i32
    %c0_i32_0 = arith.constant 0 : i32
    return %arg0, %c0_i32 : i32, i32
  }
}

</mosaic_0001>

<bundles_post_ra>
// kernel: tpu_custom_call.1
= control target key start
LH: loop header
LB: loop body
LE: loop exit
PB: predicated region body
PF: predicated region fallthrough
CT: control target
= control target key end

     0   :  { %v214_v1 = vmov 10.0   ;;  %vm66_vm1 = vcmask 130048   ;;  %s286_s1 = inlined_call_operand.vmem [shape: f32[32,16], index: 1, kind: input, shape index: {}]   ;;  %s287_s0 = inlined_call_operand.vmem [shape: f32[32,16], index: 0, kind: input, shape index: {}]   ;;  %s288_s2 = inlined_call_operand.vmem [shape: f32[32,16], index: 2, kind: output, shape index: {}]  }
   0x1   :  { %v13_v0 = vld [vmem:[%s286_s1 + $0x10] sm:$0xff]  ;;  %172 = vrcp.f32 %v214_v1  ;;  %v11_v2 = vld [vmem:[%s286_s1] sm:$0xff]  ;;  %v14_v3 = vld [vmem:[%s286_s1 + $0x18] sm:$0xff] }
   0x2   :  { %174 = vlog2.f32 %v13_v0  ;;  %v12_v4 = vld [vmem:[%s286_s1 + $0x8] sm:$0xff]  ;;  %v41_v7 = vld [vmem:[%s287_s0 + $0x10] sm:$0xff]  ;;  %v39_v10 = vld [vmem:[%s287_s0] sm:$0xff] }
   0x3   :  { %176 = vlog2.f32 %v11_v2  ;;  %v42_v15 = vld [vmem:[%s287_s0 + $0x18] sm:$0xff]  ;;  %v40_v19 = vld [vmem:[%s287_s0 + $0x8] sm:$0xff] }
   0x4   :  { %178 = vlog2.f32 %v14_v3 }
   0x5   :  { %180 = vlog2.f32 %v12_v4 }
   0x6   :  { %182 = vlog2.f32 %v41_v7 }
   0x7   :  { %v173_v5 = vpop.eup %172  ;;  %184 = vlog2.f32 %v39_v10 }
   0x8   :  { %v175_v6 = vpop.eup %174  ;;  %v56_v8 = vmul.f32 10.0, %v173_v5  ;;  %vm60_vm0 = vweird.f32 %v173_v5 }
   0x9   :  { %v20_v9 = vmul.f32 0.6931472, %v175_v6  ;;  %v177_v11 = vpop.eup %176 }
   0xa   :  { %v57_v13 = vsub.f32 1.0, %v56_v8  ;;  %v16_v14 = vmul.f32 0.6931472, %v177_v11  ;;  %v179_v16 = vpop.eup %178 }
   0xb   :  { %v25_v12 = vsub.f32 0.0, %v20_v9  ;;  %v22_v18 = vmul.f32 0.6931472, %v179_v16  ;;  %v181_v20 = vpop.eup %180 }
   0xc   :  { %v23_v17 = vsub.f32 0.0, %v16_v14  ;;  %v58_v21 = vmul.f32 %v173_v5, %v57_v13  ;;  %v18_v23 = vmul.f32 0.6931472, %v181_v20  ;;  %v183_v24 = vpop.eup %182 }
   0xd   :  { %186 = vlog2.f32 %v25_v12  ;;  %v26_v22 = vsub.f32 0.0, %v22_v18  ;;  %v185_v26 = vpop.eup %184  ;;  %v48_v31 = vmul.f32 0.6931472, %v183_v24 }
   0xe   :  { %188 = vlog2.f32 %v42_v15  ;;  %v24_v25 = vsub.f32 0.0, %v18_v23  ;;  %v59_v28 = vadd.f32 %v173_v5, %v58_v21  ;;  %v44_v36 = vmul.f32 0.6931472, %v185_v26 }
   0xf   :  { %190 = vlog2.f32 %v23_v17 }
  0x10   :  { %192 = vlog2.f32 %v40_v19  ;;  %v61_v38 = vsel %vm60_vm0, %v173_v5, %v59_v28 }
  0x11   :  { %194 = vlog2.f32 %v26_v22 }
  0x12   :  { %196 = vlog2.f32 %v24_v25 }
  0x13   :  { %v187_v27 = vpop.eup %186 }
  0x14   :  { %v189_v29 = vpop.eup %188  ;;  %v32_v30 = vmul.f32 0.6931472, %v187_v27 }
  0x15   :  { %v191_v32 = vpop.eup %190  ;;  %v50_v42 = vmul.f32 0.6931472, %v189_v29 }
  0x16   :  { %v193_v33 = vpop.eup %192  ;;  %v37_v34 = vsub.f32 0.0, %v32_v30  ;;  %v28_v35 = vmul.f32 0.6931472, %v191_v32 }
  0x17   :  { %v195_v37 = vpop.eup %194  ;;  %v46_v44 = vmul.f32 0.6931472, %v193_v33 }
  0x18   :  { %v53_v39 = vadd.f32 %v48_v31, %v37_v34  ;;  %v35_v40 = vsub.f32 0.0, %v28_v35  ;;  %v34_v41 = vmul.f32 0.6931472, %v195_v37  ;;  %v197_v43 = vpop.eup %196 }
  0x19   :  { %v30_v48 = vmul.f32 0.6931472, %v197_v43 }
  0x1a   :  { %v64_v45 = vmul.f32 %v61_v38, %v53_v39  ;;  %v51_v46 = vadd.f32 %v44_v36, %v35_v40  ;;  %v38_v47 = vsub.f32 0.0, %v34_v41 }
  0x1b   :  { %v36_v52 = vsub.f32 0.0, %v30_v48 }
  0x1c   :  { %v73_v49 = vsel %vm66_vm1, %v64_v45, -inf  ;;  %v62_v50 = vmul.f32 %v61_v38, %v51_v46  ;;  %v54_v51 = vadd.f32 %v50_v42, %v38_v47 }
  0x1d   :  { %74 = vmax.xlane.f32.xlu1 %v73_v49  ;;  %v52_v55 = vadd.f32 %v46_v44, %v36_v52 }
  0x1e   :  { %v67_v53 = vsel %vm66_vm1, %v62_v50, -inf  ;;  %v65_v54 = vmul.f32 %v61_v38, %v54_v51 }
  0x1f   :  { %68 = vmax.xlane.f32.xlu0 %v67_v53  ;;  %v63_v56 = vmul.f32 %v61_v38, %v52_v55 }
  0x20   :  { %v76_v57 = vsel %vm66_vm1, %v65_v54, -inf }
  0x21   :  { %v70_v58 = vsel %vm66_vm1, %v63_v56, -inf }
  0x25   :  { %77 = vmax.xlane.f32.xlu1 %v76_v57 }
  0x27   :  { %71 = vmax.xlane.f32.xlu0 %v70_v58 }
  0x90   :  { %v75_v59 = vpop.xlane.xlu1 %74 }
  0x91   :  { %v81_v60 = vsub.f32 %v64_v45, %v75_v59 }
  0x92   :  { %v69_v61 = vpop.xlane.xlu0 %68 }
  0x93   :  { %v87_v62 = vmul.f32 1.442695, %v81_v60  ;;  %v79_v63 = vsub.f32 %v62_v50, %v69_v61 }
  0x95   :  { %198 = vpow2.f32 %v87_v62  ;;  %v83_v0 = vmul.f32 1.442695, %v79_v63 }
  0x97   :  { %200 = vpow2.f32 %v83_v0 }
  0x98   :  { %v78_v1 = vpop.xlane.xlu1 %77 }
  0x99   :  { %v82_v2 = vsub.f32 %v65_v54, %v78_v1 }
  0x9a   :  { %v72_v3 = vpop.xlane.xlu0 %71 }
  0x9b   :  { %v199_v4 = vpop.eup %198  ;;  %v89_v5 = vmul.f32 1.442695, %v82_v2  ;;  %v80_v6 = vsub.f32 %v63_v56, %v72_v3 }
  0x9c   :  { %v97_v7 = vsel %vm66_vm1, %v199_v4, 0.0 }
  0x9d   :  { %v201_v8 = vpop.eup %200  ;;  %202 = vpow2.f32 %v89_v5  ;;  %v85_v9 = vmul.f32 1.442695, %v80_v6  ;;  %98 = vadd.xlane.f32.xlu0 %v97_v7 }
  0x9e   :  { %v91_v10 = vsel %vm66_vm1, %v201_v8, 0.0 }
  0x9f   :  { %204 = vpow2.f32 %v85_v9  ;;  %92 = vadd.xlane.f32.xlu2 %v91_v10 }
  0xa3   :  { %v260_v11 = vpop.eup %202 }
  0xa4   :  { %v100_v12 = vsel %vm66_vm1, %v260_v11, 0.0 }
  0xa5   :  { %v264_v13 = vpop.eup %204  ;;  %101 = vadd.xlane.f32.xlu1 %v100_v12 }
  0xa6   :  { %v94_v14 = vsel %vm66_vm1, %v264_v13, 0.0 }
  0xa7   :  { %95 = vadd.xlane.f32.xlu2 %v94_v14 }
 0x110   :  { %v99_v15 = vpop.xlane.xlu0 %98 }
 0x111   :  { %206 = vrcp.f32 %v99_v15  ;;  %v144_v24 = vand.u32 2147483648, %v99_v15  ;;  %v142_v27 = vand.u32 2147483647, %v99_v15  ;;  %vm138_vm4 = vweird.f32 %v99_v15 }
 0x112   :  { %v93_v16 = vpop.xlane.xlu2 %92 }
 0x113   :  { %208 = vrcp.f32 %v93_v16  ;;  %v112_v28 = vand.u32 2147483647, %v93_v16  ;;  %v114_v29 = vand.u32 2147483648, %v93_v16  ;;  %vm108_vm5 = vweird.f32 %v93_v16 }
 0x114   :  { %v145_v33 = vor.u32 1.1754944e-38, %v144_v24  ;;  %vm143_vm7 = vcmp.eq.f32.partialorder %v142_v27, 8.507059e+37 }
 0x115   :  { %vm113_vm9 = vcmp.eq.f32.partialorder %v112_v28, 8.507059e+37  ;;  %v115_v38 = vor.u32 1.1754944e-38, %v114_v29 }
 0x117   :  { %v207_v17 = vpop.eup %206 }
 0x118   :  { %v134_v18 = vmul.f32 %v207_v17, %v99_v15  ;;  %v102_v19 = vpop.xlane.xlu1 %101  ;;  %vm139_vm2 = vweird.f32 %v207_v17 }
 0x119   :  { %v209_v20 = vpop.eup %208  ;;  %210 = vrcp.f32 %v102_v19  ;;  %vm140_vm6 = vmor %vm138_vm4, %vm139_vm2  ;;  %v157_v45 = vand.u32 2147483647, %v102_v19  ;;  %v159_v46 = vand.u32 2147483648, %v102_v19  ;;  %vm153_vm11 = vweird.f32 %v102_v19 }
 0x11a   :  { %v104_v21 = vmul.f32 %v209_v20, %v93_v16  ;;  %v135_v22 = vsub.f32 1.0, %v134_v18  ;;  %v96_v23 = vpop.xlane.xlu2 %95  ;;  %vm109_vm3 = vweird.f32 %v209_v20 }
 0x11b   :  { %212 = vrcp.f32 %v96_v23  ;;  %vm110_vm8 = vmor %vm108_vm5, %vm109_vm3  ;;  %v129_v50 = vand.u32 2147483648, %v96_v23  ;;  %v127_v53 = vand.u32 2147483647, %v96_v23  ;;  %v160_v54 = vor.u32 1.1754944e-38, %v159_v46 }
 0x11c   :  { %v105_v25 = vsub.f32 1.0, %v104_v21  ;;  %v136_v26 = vmul.f32 %v207_v17, %v135_v22  ;;  %vm158_vm14 = vcmp.eq.f32.partialorder %v157_v45, 8.507059e+37  ;;  %vm123_vm15 = vweird.f32 %v96_v23 }
 0x11d   :  { %v130_v58 = vor.u32 1.1754944e-38, %v129_v50  ;;  %vm128_vm2 = vcmp.eq.f32.partialorder %v127_v53, 8.507059e+37 }
 0x11e   :  { %v106_v30 = vmul.f32 %v209_v20, %v105_v25  ;;  %v137_v31 = vadd.f32 %v207_v17, %v136_v26 }
 0x11f   :  { %v211_v32 = vpop.eup %210 }
 0x120   :  { %v107_v34 = vadd.f32 %v209_v20, %v106_v30  ;;  %v141_v35 = vsel %vm140_vm6, %v207_v17, %v137_v31  ;;  %v149_v36 = vmul.f32 %v211_v32, %v102_v19  ;;  %vm154_vm10 = vweird.f32 %v211_v32 }
 0x121   :  { %v213_v37 = vpop.eup %212  ;;  %v146_v39 = vsel %vm143_vm7, %v145_v33, %v141_v35  ;;  %vm155_vm13 = vmor %vm153_vm11, %vm154_vm10 }
 0x122   :  { %v111_v40 = vsel %vm110_vm8, %v209_v20, %v107_v34  ;;  %v147_v41 = vmul.f32 %v199_v4, %v146_v39  ;;  %v150_v42 = vsub.f32 1.0, %v149_v36  ;;  %v119_v43 = vmul.f32 %v213_v37, %v96_v23 }
 0x123   :  { %v116_v44 = vsel %vm113_vm9, %v115_v38, %v111_v40  ;;  %vm124_vm12 = vweird.f32 %v213_v37 }
 0x124   :  { %v117_v47 = vmul.f32 %v201_v8, %v116_v44  ;;  %165 = vst.msk [vmem:[%s288_s2 + $0x10] sm:$0xff] %vm66_vm1, %v147_v41  ;;  %v151_v48 = vmul.f32 %v211_v32, %v150_v42  ;;  %v120_v49 = vsub.f32 1.0, %v119_v43  ;;  %vm125_vm0 = vmor %vm123_vm15, %vm124_vm12 }
 0x126   :  { %163 = vst.msk [vmem:[%s288_s2] sm:$0xff] %vm66_vm1, %v117_v47  ;;  %v152_v51 = vadd.f32 %v211_v32, %v151_v48  ;;  %v121_v52 = vmul.f32 %v213_v37, %v120_v49 }
 0x128   :  { %v156_v55 = vsel %vm155_vm13, %v211_v32, %v152_v51  ;;  %v122_v56 = vadd.f32 %v213_v37, %v121_v52 }
 0x129   :  { %v161_v57 = vsel %vm158_vm14, %v160_v54, %v156_v55 }
 0x12a   :  { %v162_v59 = vmul.f32 %v260_v11, %v161_v57  ;;  %v126_v60 = vsel %vm125_vm0, %v213_v37, %v122_v56 }
 0x12b   :  { %v131_v61 = vsel %vm128_vm2, %v130_v58, %v126_v60 }
 0x12c   :  { %166 = vst.msk [vmem:[%s288_s2 + $0x18] sm:$0xff] %vm66_vm1, %v162_v59  ;;  %v132_v62 = vmul.f32 %v264_v13, %v131_v61 }
 0x12e   :  { %164 = vst.msk [vmem:[%s288_s2 + $0x8] sm:$0xff] %vm66_vm1, %v132_v62 }

</bundles_post_ra>
